<compile_context>
chip_gen: v7x
topology: tpu7x:2x2x1
jax: 0.10.0
libtpu: 0.0.40
codegen_flags: <defaults>
</compile_context>

<pallas_src>
import functools

import jax
import jax.numpy as jnp
from jax import lax
from jax.experimental import pallas as pl
from jax.experimental.pallas import tpu as pltpu


_SQRT_HALF = 0.7071067811865476        # 1/sqrt(2)
_SQRT_2_OVER_PI = 0.7978845608028654   # sqrt(2/pi)


def _intermediate_kernel(xt_ref, xe_ref, wt_ref, we_ref, b_ref, o_ref,
                         *, approximate_gelu):
    """One tile: (tm,H)@(H,tn) + (tm,He)@(He,tn) -> +bias -> GELU -> store."""
    cdt = wt_ref.dtype
    acc = jnp.dot(xt_ref[...].astype(cdt), wt_ref[...],
                  preferred_element_type=jnp.float32)
    acc = acc + jnp.dot(xe_ref[...].astype(cdt), we_ref[...],
                        preferred_element_type=jnp.float32)
    h = acc + b_ref[...]                       # (1, tn) f32 bias broadcasts over rows
    if approximate_gelu:
        # tanh-approx GELU: transcendental goes to the EUP slot (free vs VALU).
        g = 0.5 * h * (1.0 + jnp.tanh(jnp.float32(_SQRT_2_OVER_PI)
                                      * (h + jnp.float32(0.044715) * h * h * h)))
    else:
        # Exact erf-based GELU (ACT2FN["gelu"] / torch F.gelu default), in f32.
        g = 0.5 * h * (1.0 + lax.erf(h * jnp.float32(_SQRT_HALF)))
    o_ref[...] = g.astype(o_ref.dtype)


def prepare_coke_bert_intermediate_params(w_text, b_text, w_ent,
                                          compute_dtype=jnp.bfloat16):
    """One-time (load-time) weight preparation.

    w_text: [I, H] (nn.Linear layout), b_text: [I], w_ent: [I, He].
    Returns (w_text_T [H, I], w_ent_T [He, I]) in compute_dtype and bias [1, I] f32.
    """
    wt = jnp.asarray(w_text).T.astype(compute_dtype)
    we = jnp.asarray(w_ent).T.astype(compute_dtype)
    bias = jnp.asarray(b_text).reshape(1, -1).astype(jnp.float32)
    return wt, we, bias


def _round_up(x, m):
    return ((x + m - 1) // m) * m


def _physical_vmem_bytes():
    try:
        info = pltpu.get_tpu_info()
        v = getattr(info, "vmem_capacity_bytes", None)
        if v:
            return int(v)
    except Exception:
        pass
    return 64 << 20   # conservative fallback (v7x per-TC VMEM)


def coke_bert_intermediate(hidden_text, hidden_ent, w_text_t, w_ent_t, bias, *,
                           tm=512, tn=None, out_dtype=None,
                           approximate_gelu=False, vmem_limit_bytes=None):
    """hidden_text: [B, S, H], hidden_ent: [B, S, He];
    w_text_t: [H, I], w_ent_t: [He, I] (see prepare_coke_bert_intermediate_params);
    bias: [1, I] float32."""
    B, S, H = hidden_text.shape
    He = hidden_ent.shape[-1]
    assert w_text_t.shape[0] == H and w_ent_t.shape[0] == He, (
        w_text_t.shape, w_ent_t.shape, H, He)
    I = w_text_t.shape[1]
    assert w_ent_t.shape[1] == I and bias.shape == (1, I)
    M = B * S

    if out_dtype is None:
        out_dtype = hidden_text.dtype

    xt = hidden_text.reshape(M, H)
    xe = hidden_ent.reshape(M, He)

    sx_t = jnp.dtype(hidden_text.dtype).itemsize
    sx_e = jnp.dtype(hidden_ent.dtype).itemsize
    sw = jnp.dtype(w_text_t.dtype).itemsize
    so = jnp.dtype(out_dtype).itemsize

    # Row tile: multiple of 16 for packed (bf16) compute, 8 for f32.
    row_mult = 16 if sw < 4 else 8
    tm_eff = max(row_mult, min(_round_up(tm, row_mult), _round_up(M, row_mult)))

    def est_bytes(tmv, tnv):
        per = (tmv * H * sx_t + tmv * He * sx_e          # activation tiles
               + H * tnv * sw + He * tnv * sw            # weight tiles
               + tnv * 4                                 # bias tile (f32)
               + tmv * tnv * so)                         # output tile
        return 2 * per + tmv * tnv * 4                   # double-buffered + f32 epilogue

    phys = _physical_vmem_bytes()
    budget = max(phys - (16 << 20), 24 << 20)            # leave headroom below physical

    if tn is not None:
        tn_eff = I if I <= tn else tn
    else:
        # Prefer full I (weight slab fully resident, activations read exactly once).
        # Otherwise the largest 128-multiple divisor of I -> dense, even j-tiles.
        cands = [I]
        if I % 128 == 0 and I > 128:
            cands += [c for c in range(I - 128, 0, -128) if I % c == 0]
        tn_eff = None
        tm_pick = tm_eff
        while tn_eff is None:
            for c in cands:
                if est_bytes(tm_pick, c) <= budget:
                    tn_eff = c
                    break
            if tn_eff is None:
                if tm_pick <= 4 * row_mult:
                    tn_eff = cands[-1]
                    break
                tm_pick = max(row_mult, _round_up(tm_pick // 2, row_mult))
        tm_eff = tm_pick

    nj = pl.cdiv(I, tn_eff)   # intermediate-size tiles (outer grid axis)
    ni = pl.cdiv(M, tm_eff)   # token tiles            (inner grid axis)

    if vmem_limit_bytes is None:
        vmem_limit_bytes = int(min(budget,
                                   max(2 * est_bytes(tm_eff, tn_eff), 32 << 20)))

    kernel = functools.partial(_intermediate_kernel,
                               approximate_gelu=approximate_gelu)

    out = pl.pallas_call(
        kernel,
        out_shape=jax.ShapeDtypeStruct((M, I), out_dtype),
        grid_spec=pltpu.PrefetchScalarGridSpec(
            num_scalar_prefetch=0,
            # I axis OUTER, M axis INNER: weight/bias block indices depend only
            # on j, so they stay VMEM-resident across the inner M loop.  In the
            # common auto-tiled case nj == 1, so the (large, evenly divisible)
            # M axis is the one the megacore split lands on.
            grid=(nj, ni),
            in_specs=[
                pl.BlockSpec((tm_eff, H), lambda j, i: (i, 0)),    # text activations
                pl.BlockSpec((tm_eff, He), lambda j, i: (i, 0)),   # entity activations
                pl.BlockSpec((H, tn_eff), lambda j, i: (0, j)),    # W_text^T slab
                pl.BlockSpec((He, tn_eff), lambda j, i: (0, j)),   # W_ent^T slab
                pl.BlockSpec((1, tn_eff), lambda j, i: (0, j)),    # bias (f32)
            ],
            out_specs=pl.BlockSpec((tm_eff, tn_eff), lambda j, i: (i, j)),
        ),
        compiler_params=pltpu.CompilerParams(
            dimension_semantics=("parallel", "parallel"),
            vmem_limit_bytes=vmem_limit_bytes,
        ),
    )(xt, xe, w_text_t, w_ent_t, bias)

    return out.reshape(B, S, I)


if __name__ == "__main__":
    # Small config consistent with CokeBertIntermediate:
    #   hidden_size=32, hidden_size_ent=16, intermediate_size=64
    B, S = 2, 8
    H, He, I = 32, 16, 64

    key = jax.random.PRNGKey(0)
    k1, k2, k3, k4, k5 = jax.random.split(key, 5)

    hidden_text = jax.random.normal(k1, (B, S, H), dtype=jnp.float32)
    hidden_ent = jax.random.normal(k2, (B, S, He), dtype=jnp.float32)
    w_text = jax.random.normal(k3, (I, H), dtype=jnp.float32) * 0.05
    b_text = jax.random.normal(k4, (I,), dtype=jnp.float32) * 0.05
    w_ent = jax.random.normal(k5, (I, He), dtype=jnp.float32) * 0.05

    # ---- f32 path: exact-semantics check against the PyTorch formula ----
    wt32, we32, bias32 = prepare_coke_bert_intermediate_params(
        w_text, b_text, w_ent, compute_dtype=jnp.float32)
    out_f32 = coke_bert_intermediate(hidden_text, hidden_ent, wt32, we32, bias32)
    jax.block_until_ready(out_f32)

    ref = jax.nn.gelu(
        jnp.einsum("bsh,ih->bsi", hidden_text, w_text) + b_text
        + jnp.einsum("bse,ie->bsi", hidden_ent, w_ent),
        approximate=False,
    )
    assert out_f32.shape == (B, S, I)
    assert jnp.allclose(out_f32, ref, atol=1e-4, rtol=1e-4), (
        float(jnp.max(jnp.abs(out_f32 - ref))))

    # ---- bf16 (production) path: bf16 MXU inputs (cast in-kernel), f32 accum ----
    # NOTE: bf16 MXU inputs differ from PyTorch f32 semantics at ~1e-2 tolerance.
    wt16, we16, bias16 = prepare_coke_bert_intermediate_params(
        w_text, b_text, w_ent, compute_dtype=jnp.bfloat16)
    out_bf = coke_bert_intermediate(hidden_text, hidden_ent, wt16, we16, bias16)
    jax.block_until_ready(out_bf)

    xt_b = hidden_text.reshape(B * S, H).astype(jnp.bfloat16)
    xe_b = hidden_ent.reshape(B * S, He).astype(jnp.bfloat16)
    h_ref = (jnp.dot(xt_b, wt16, preferred_element_type=jnp.float32)
             + jnp.dot(xe_b, we16, preferred_element_type=jnp.float32)
             + b_text.astype(jnp.float32))
    ref_bf = jax.nn.gelu(h_ref, approximate=False).reshape(B, S, I)
    assert out_bf.shape == (B, S, I)
    assert jnp.allclose(out_bf, ref_bf, atol=1e-2, rtol=1e-2), (
        float(jnp.max(jnp.abs(out_bf - ref_bf))))

    # ---- bf16 output stream (halves the largest HBM write) ----
    out_bf16_out = coke_bert_intermediate(hidden_text, hidden_ent, wt16, we16,
                                          bias16, out_dtype=jnp.bfloat16)
    jax.block_until_ready(out_bf16_out)
    assert out_bf16_out.dtype == jnp.bfloat16
    assert jnp.allclose(out_bf16_out.astype(jnp.float32), ref_bf,
                        atol=3e-2, rtol=3e-2)

    print("KERNEL_OK")
</pallas_src>

<mosaic_0001>
module attributes {stable_mosaic.version = 11 : i64} {
  func.func @_intermediate_kernel(%arg0: i32, %arg1: i32, %arg2: memref<16x32xf32, #tpu.memory_space<vmem>>, %arg3: memref<16x16xf32, #tpu.memory_space<vmem>>, %arg4: memref<32x64xf32, #tpu.memory_space<vmem>>, %arg5: memref<16x64xf32, #tpu.memory_space<vmem>>, %arg6: memref<1x64xf32, #tpu.memory_space<vmem>>, %arg7: memref<16x64xf32, #tpu.memory_space<vmem>>) attributes {dimension_semantics = [#tpu.dimension_semantics<parallel>, #tpu.dimension_semantics<parallel>], iteration_bounds = array<i64: 1, 1>, scalar_prefetch = 0 : i64, scratch_operands = 0 : i64, tpu.core_type = #tpu.core_type<tc>, window_params = [{transform_indices = @transform_0, window_bounds = array<i64: 16, 32>}, {transform_indices = @transform_1, window_bounds = array<i64: 16, 16>}, {transform_indices = @transform_2, window_bounds = array<i64: 32, 64>}, {transform_indices = @transform_3, window_bounds = array<i64: 16, 64>}, {transform_indices = @transform_4, window_bounds = array<i64: 1, 64>}, {transform_indices = @transform_5, window_bounds = array<i64: 16, 64>}]} {
    %c0 = arith.constant 0 : index
    %c0_0 = arith.constant 0 : index
    %0 = vector.load %arg2[%c0, %c0_0] : memref<16x32xf32, #tpu.memory_space<vmem>>, vector<16x32xf32>
    %c0_1 = arith.constant 0 : index
    %c0_2 = arith.constant 0 : index
    %1 = vector.load %arg4[%c0_1, %c0_2] : memref<32x64xf32, #tpu.memory_space<vmem>>, vector<32x64xf32>
    %cst = arith.constant dense<0.000000e+00> : vector<16x64xf32>
    %2 = tpu.matmul %0, %1, %cst {dimension_numbers = #tpu.dot_dimension_numbers<[1], [0], [0], [1], [0, 0, 1, 1], [], []>} : vector<16x32xf32>, vector<32x64xf32>, vector<16x64xf32> -> vector<16x64xf32>
    %c0_3 = arith.constant 0 : index
    %c0_4 = arith.constant 0 : index
    %3 = vector.load %arg3[%c0_3, %c0_4] : memref<16x16xf32, #tpu.memory_space<vmem>>, vector<16x16xf32>
    %c0_5 = arith.constant 0 : index
    %c0_6 = arith.constant 0 : index
    %4 = vector.load %arg5[%c0_5, %c0_6] : memref<16x64xf32, #tpu.memory_space<vmem>>, vector<16x64xf32>
    %cst_7 = arith.constant dense<0.000000e+00> : vector<16x64xf32>
    %5 = tpu.matmul %3, %4, %cst_7 {dimension_numbers = #tpu.dot_dimension_numbers<[1], [0], [0], [1], [0, 0, 1, 1], [], []>} : vector<16x16xf32>, vector<16x64xf32>, vector<16x64xf32> -> vector<16x64xf32>
    %6 = arith.addf %2, %5 : vector<16x64xf32>
    %c0_8 = arith.constant 0 : index
    %c0_9 = arith.constant 0 : index
    %7 = vector.load %arg6[%c0_8, %c0_9] : memref<1x64xf32, #tpu.memory_space<vmem>>, vector<1x64xf32>
    %8 = vector.broadcast %7 : vector<1x64xf32> to vector<16x64xf32>
    %9 = arith.addf %6, %8 : vector<16x64xf32>
    %cst_10 = arith.constant 5.000000e-01 : f32
    %10 = vector.broadcast %cst_10 : f32 to vector<16x64xf32>
    %11 = arith.mulf %10, %9 : vector<16x64xf32>
    %cst_11 = arith.constant 0.707106769 : f32
    %12 = vector.broadcast %cst_11 : f32 to vector<16x64xf32>
    %13 = arith.mulf %9, %12 : vector<16x64xf32>
    %14 = math.erf %13 : vector<16x64xf32>
    %cst_12 = arith.constant 1.000000e+00 : f32
    %15 = vector.broadcast %cst_12 : f32 to vector<16x64xf32>
    %16 = arith.addf %15, %14 : vector<16x64xf32>
    %17 = arith.mulf %11, %16 : vector<16x64xf32>
    %c0_13 = arith.constant 0 : index
    %c0_14 = arith.constant 0 : index
    %18 = vector.load %arg7[%c0_13, %c0_14] : memref<16x64xf32, #tpu.memory_space<vmem>>, vector<16x64xf32>
    tpu.vector_store %arg7[%c0_13, %c0_14], %17 {strides = array<i32>} : memref<16x64xf32, #tpu.memory_space<vmem>>, vector<16x64xf32>,
    return
  }
  func.func @transform_0(%arg0: i32, %arg1: i32) -> (i32, i32) {
    %c0_i32 = arith.constant 0 : i32
    %c0_i32_0 = arith.constant 0 : i32
    return %arg1, %c0_i32 : i32, i32
  }
  func.func @transform_1(%arg0: i32, %arg1: i32) -> (i32, i32) {
    %c0_i32 = arith.constant 0 : i32
    %c0_i32_0 = arith.constant 0 : i32
    return %arg1, %c0_i32 : i32, i32
  }
  func.func @transform_2(%arg0: i32, %arg1: i32) -> (i32, i32) {
    %c0_i32 = arith.constant 0 : i32
    %c0_i32_0 = arith.constant 0 : i32
    return %c0_i32, %arg0 : i32, i32
  }
  func.func @transform_3(%arg0: i32, %arg1: i32) -> (i32, i32) {
    %c0_i32 = arith.constant 0 : i32
    %c0_i32_0 = arith.constant 0 : i32
    return %c0_i32, %arg0 : i32, i32
  }
  func.func @transform_4(%arg0: i32, %arg1: i32) -> (i32, i32) {
    %c0_i32 = arith.constant 0 : i32
    %c0_i32_0 = arith.constant 0 : i32
    return %c0_i32, %arg0 : i32, i32
  }
  func.func @transform_5(%arg0: i32, %arg1: i32) -> (i32, i32) {
    %c0_i32 = arith.constant 0 : i32
    return %arg1, %arg0 : i32, i32
  }
}

</mosaic_0001>

<bundles_post_ra>
// kernel: tpu_custom_call.1
= control target key start
LH: loop header
LB: loop body
LE: loop exit
PB: predicated region body
PF: predicated region fallthrough
CT: control target
= control target key end

     0   :  { %10 = vsyncpa [#allocation3], 0  ;;  %s598_s0 = inlined_call_operand.hbm [shape: f32[16,32], index: 0, kind: input, shape index: {}]   ;;  %s599_s1 = inlined_call_operand.hbm [shape: f32[16,16], index: 1, kind: input, shape index: {}]   ;;  %s600_s2 = inlined_call_operand.hbm [shape: f32[32,64], index: 2, kind: input, shape index: {}]   ;;  %s601_s3 = inlined_call_operand.hbm [shape: f32[16,64], index: 3, kind: input, shape index: {}]   ;;  %s602_s4 = inlined_call_operand.vmem [shape: f32[1,64], index: 4, kind: input, shape index: {}]   ;;  %s603_s5 = inlined_call_operand.hbm [shape: f32[16,64], index: 5, kind: output, shape index: {}]  }
   0x1   :  { %11 = vsyncpa [#allocation6], 0 }
   0x2   :  { %12 = vsyncpa [#allocation9], 0 }
   0x3   :  { %13 = vsyncpa [#allocation4], 0  ;;  %s467_s18 = smov [#allocation5]   ;;  %s468_s20 = smov [#allocation2]  }
   0x4   :  { %s31_s19 = sshll.u32 %s467_s18, 4  ;;  %s19_s21 = sshll.u32 %s468_s20, 4  ;;  %s32_s19 = int_to_ptr.vmem [resolvable:$true] %s31_s19  ;;  %s504_s21 = int_to_ptr.vmem [resolvable:$true] %s19_s21 }
   0x5   :  { %s349_s24 = scalar_lea.hbm %s599_s1, 256 }
   0x6   :  { %p350_p0 = scmp.ne.s32.totalorder %s599_s1, %s349_s24  ;;  %p353_p1 = scmp.lt.u32.totalorder %s349_s24, %s599_s1 }
   0x8   :  { %p355_p2 = pnand %p353_p1, %p350_p0 }
   0xa   :  { %358 = shalt.err (!%p355_p2)
}
   0xb   :  { %s359_s29 = scalar_lea.vmem %s32_s19, 256  ;;  %p364_p4 = scmp.lt.s32.totalorder %s32_s19, %s32_s19 }
   0xc   :  { %p360_p3 = scmp.ne.s32.totalorder %s32_s19, %s359_s29  ;;  %p365_p5 = scmp.lt.s32.totalorder %s359_s29, %s359_s29 }
   0xe   :  { %p366_p6 = por %p365_p5, %p364_p4 }
  0x10   :  { %p367_p7 = pnand %p366_p6, %p360_p3 }
  0x12   :  { %370 = shalt.err (!%p367_p7)
}
  0x13   :  { %s469_s30 = smov 128   ;;  %s470_s6 = smov 8  }
  0x14   :  { %37 = dma.hbm_to_vmem [thread:$0]  %s599_s1, 256, %s32_s19, [#allocation6], %s469_s30, %s469_s30, %s470_s6  }
  0x15   :  { %s371_s11 = scalar_lea.hbm %s598_s0, 256 }
  0x16   :  { %p372_p8 = scmp.ne.s32.totalorder %s598_s0, %s371_s11  ;;  %p375_p9 = scmp.lt.u32.totalorder %s371_s11, %s598_s0 }
  0x18   :  { %p377_p10 = pnand %p375_p9, %p372_p8 }
  0x1a   :  { %380 = shalt.err (!%p377_p10)
}
  0x1b   :  { %s381_s16 = scalar_lea.vmem %s504_s21, 256  ;;  %p386_p12 = scmp.lt.s32.totalorder %s504_s21, %s504_s21 }
  0x1c   :  { %p382_p11 = scmp.ne.s32.totalorder %s504_s21, %s381_s16  ;;  %p387_p13 = scmp.lt.s32.totalorder %s381_s16, %s381_s16 }
  0x1e   :  { %p388_p0 = por %p387_p13, %p386_p12 }
  0x20   :  { %p389_p1 = pnand %p388_p0, %p382_p11 }
  0x22   :  { %392 = shalt.err (!%p389_p1)
}
  0x23   :  { %25 = dma.hbm_to_vmem [thread:$0]  %s598_s0, 256, %s504_s21, [#allocation3], %s469_s30, %s469_s30, %s470_s6  }
  0x24   :  { %s471_s18 = smov [#allocation7]   ;;  %s472_s20 = smov [#allocation8]  }
  0x25   :  { %s43_s19 = sshll.u32 %s471_s18, 4  ;;  %s55_s22 = sshll.u32 %s472_s20, 4  ;;  %s44_s19 = int_to_ptr.vmem [resolvable:$true] %s43_s19  ;;  %s541_s22 = int_to_ptr.vmem [resolvable:$true] %s55_s22 }
  0x26   :  { %s393_s25 = scalar_lea.hbm %s600_s2, 512 }
  0x27   :  { %p394_p2 = scmp.ne.s32.totalorder %s600_s2, %s393_s25  ;;  %p397_p3 = scmp.lt.u32.totalorder %s393_s25, %s600_s2 }
  0x29   :  { %p399_p4 = pnand %p397_p3, %p394_p2 }
  0x2b   :  { %402 = shalt.err (!%p399_p4)
}
  0x2c   :  { %s403_s0 = scalar_lea.vmem %s44_s19, 512  ;;  %p408_p6 = scmp.lt.s32.totalorder %s44_s19, %s44_s19 }
  0x2d   :  { %p404_p5 = scmp.ne.s32.totalorder %s44_s19, %s403_s0  ;;  %p409_p7 = scmp.lt.s32.totalorder %s403_s0, %s403_s0 }
  0x2f   :  { %p410_p8 = por %p409_p7, %p408_p6 }
  0x31   :  { %p411_p9 = pnand %p410_p8, %p404_p5 }
  0x33   :  { %414 = shalt.err (!%p411_p9)
}
  0x34   :  { %49 = dma.hbm_to_vmem [thread:$0]  %s600_s2, 512, %s44_s19, [#allocation6], %s469_s30, %s469_s30, %s470_s6  }
  0x35   :  { %s415_s10 = scalar_lea.hbm %s601_s3, 256 }
  0x36   :  { %p416_p10 = scmp.ne.s32.totalorder %s601_s3, %s415_s10  ;;  %p419_p11 = scmp.lt.u32.totalorder %s415_s10, %s601_s3 }
  0x38   :  { %p421_p12 = pnand %p419_p11, %p416_p10 }
  0x3a   :  { %424 = shalt.err (!%p421_p12)
}
  0x3b   :  { %s425_s15 = scalar_lea.vmem %s541_s22, 256  ;;  %p430_p0 = scmp.lt.s32.totalorder %s541_s22, %s541_s22 }
  0x3c   :  { %p426_p13 = scmp.ne.s32.totalorder %s541_s22, %s425_s15  ;;  %p431_p1 = scmp.lt.s32.totalorder %s425_s15, %s425_s15 }
  0x3e   :  { %p432_p2 = por %p431_p1, %p430_p0 }
  0x40   :  { %p433_p3 = pnand %p432_p2, %p426_p13 }
  0x42   :  { %436 = shalt.err (!%p433_p3)
}
  0x43   :  { %61 = dma.hbm_to_vmem [thread:$0]  %s601_s3, 256, %s541_s22, [#allocation9], %s469_s30, %s469_s30, %s470_s6  }
  0x44   :  { %459 = dma.done.wait [#allocation3], 256  }
  0x45   :  { %460 = vsyncadd [#allocation3], 4294967040 }
  0x46   :  { %461 = dma.done.wait [#allocation6], 768  }
  0x47   :  { %462 = vsyncadd [#allocation6], 4294966528 }
  0x48   :  { %463 = dma.done.wait [#allocation9], 256  }
  0x49   :  { %464 = vsyncadd [#allocation9], 4294967040  ;;  %v78_v0 = vld [vmem:[#allocation7] sm:$0xff]  ;;  %v79_v1 = vld [vmem:[#allocation7 + $0x8] sm:$0xff]  ;;  %vm86_vm0 = vcmask 130048   ;;  %vm168_vm1 = vcmask 261120  }
  0x4a   :  { %v84_v2 = vld [vmem:[#allocation8] sm:$0xff]  ;;  %v328_v3 = vpack.c.bf16 %v79_v1, %v78_v0  ;;  %v85_v4 = vld [vmem:[#allocation8 + $0x8] sm:$0xff]  ;;  %v80_v5 = vld [vmem:[#allocation7 + $0x10] sm:$0xff]  ;;  %s473_s17 = smov [#allocation10]   ;;  %vm269_vm2 = vcmask 523264  }
  0x4b   :  { %v81_v6 = vld [vmem:[#allocation7 + $0x18] sm:$0xff]  ;;  %v324_v7 = vpack.c.bf16 %v85_v4, %v84_v2  ;;  %v82_v9 = vld [vmem:[#allocation5] sm:$0xff]  ;;  %v76_v10 = vld [vmem:[#allocation2] sm:$0xff]  ;;  %s277_s18 = sshll.u32 %s473_s17, 4  ;;  %s278_s18 = int_to_ptr.vmem [resolvable:$true] %s277_s18 }
  0x4c   :  { %v332_v8 = vpack.c.bf16 %v81_v6, %v80_v5  ;;  %329 = vmatprep.subr.bf16.mxu0 %v328_v3  ;;  %310 = vmatprep.mubr.msk.f32.mxu1 %vm86_vm0, %v82_v9  ;;  %v83_v11 = vld [vmem:[#allocation5 + $0x8] sm:$0xff]  ;;  %v77_v12 = vld [vmem:[#allocation2 + $0x8] sm:$0xff]  ;;  %v295_v16 = vld [vmem:[%s602_s4] ss:$0 sm:$0xff]  ;;  %s437_s4 = scalar_lea.vmem %s278_s18, 256  ;;  %p442_p5 = scmp.lt.s32.totalorder %s278_s18, %s278_s18 }
  0x4d   :  { %331 = vmatpush3.bf16.msra.mxu0 %v328_v3  ;;  %325 = vmatprep.subr.bf16.mxu1 %v324_v7  ;;  %p438_p4 = scmp.ne.s32.totalorder %s278_s18, %s437_s4  ;;  %p443_p6 = scmp.lt.s32.totalorder %s437_s4, %s437_s4 }
  0x4e   :  { %327 = vmatpush3.bf16.msra.mxu1 %v324_v7  ;;  %333 = vmatprep.subr.bf16.mxu0 %v332_v8 }
  0x4f   :  { %321 = vmatprep.mubr.msk.f32.mxu0 %vm168_vm1, %v76_v10  ;;  %p444_p7 = por %p443_p6, %p442_p5 }
  0x51   :  { %335 = vmatpush3.bf16.msra.mxu0 %v332_v8  ;;  %311 = vmatmul.mubr.msk.f32.vlgmr.msra.gmra.mrb[0].mxu1 %vm86_vm0, %v83_v11  ;;  %p445_p8 = pnand %p444_p7, %p438_p4 }
  0x54   :  { %322 = vmatmul.mubr.msk.f32.vlgmr.msra.gmra.mrb[0].mxu0 %vm168_vm1, %v77_v12 }
 0x124   :  { %v312_v13 = vpop.f32.mrb[0].mxu1 }
 0x125   :  { %v159_v14 = vpop.f32.mrb[1].mxu1 }
 0x127   :  { %v323_v15 = vpop.f32.mrb[0].mxu0 }
 0x128   :  { %v247_v17 = vadd.f32 %v323_v15, %v312_v13  ;;  %v241_v18 = vpop.f32.mrb[1].mxu0 }
 0x129   :  { %v242_v19 = vadd.f32 %v241_v18, %v159_v14 }
 0x12a   :  { %v258_v20 = vadd.f32 %v295_v16, %v247_v17 }
 0x12b   :  { %v257_v21 = vadd.f32 %v295_v16, %v242_v19 }
 0x12c   :  { %v262_v22 = vmul.f32 0.70710677, %v258_v20  ;;  %v260_v26 = vmul.f32 0.5, %v258_v20 }
 0x12d   :  { %v261_v23 = vmul.f32 0.70710677, %v257_v21  ;;  %v259_v28 = vmul.f32 0.5, %v257_v21 }
 0x12e   :  { %345 = verf.f32 %v262_v22 }
 0x12f   :  { %347 = verf.f32 %v261_v23 }
 0x138   :  { %v346_v24 = vpop.eup %345 }
 0x139   :  { %v348_v25 = vpop.eup %347  ;;  %v266_v27 = vadd.f32 1.0, %v346_v24 }
 0x13a   :  { %v265_v29 = vadd.f32 1.0, %v348_v25 }
 0x13b   :  { %v268_v30 = vmul.f32 %v266_v27, %v260_v26 }
 0x13c   :  { %v267_v31 = vmul.f32 %v265_v29, %v259_v28 }
 0x13d   :  { %271 = vst.msk [vmem:[#allocation10 + $0x8] sm:$0xff] %vm269_vm2, %v268_v30 }
 0x13e   :  { %270 = vst.msk [vmem:[#allocation10] sm:$0xff] %vm269_vm2, %v267_v31 }
 0x13f   :  { %448 = shalt.err (!%p445_p8)
}
 0x140   :  { %s449_s22 = scalar_lea.hbm %s603_s5, 256 }
 0x141   :  { %p450_p9 = scmp.ne.s32.totalorder %s603_s5, %s449_s22  ;;  %p453_p10 = scmp.lt.u32.totalorder %s449_s22, %s603_s5 }
 0x143   :  { %p455_p11 = pnand %p453_p10, %p450_p9 }
 0x145   :  { %458 = shalt.err (!%p455_p11)
}
 0x146   :  { %283 = dma.vmem_to_hbm [thread:$0]  %s278_s18, 256, %s603_s5, [#allocation4], %s469_s30, %s469_s30, %s470_s6  }
 0x147   :  { %465 = dma.done.wait [#allocation4], 256  }
 0x148   :  { %466 = vsyncadd [#allocation4], 4294967040 }
 0x149   :  { %287 = vsyncpa [#allocation3], 1 }
 0x14a   :  { %288 = vsyncpa [#allocation6], 1 }
 0x14b   :  { %289 = vsyncpa [#allocation9], 1 }
 0x14c   :  { %290 = vsyncpa [#allocation4], 1 }

</bundles_post_ra>
